<compile_context>
chip_gen: v7x
topology: tpu7x:2x2x1
jax: 0.10.0
libtpu: 0.0.40
codegen_flags: <defaults>
</compile_context>

<pallas_src>
import functools

import jax
import jax.numpy as jnp
from jax.experimental import pallas as pl
from jax.experimental.pallas import tpu as pltpu


def _word_embedding_kernel(ids_ref, emb_hbm, gamma_ref, beta_ref, out_ref,
                           row_buf, sem, *, eps, tm, n_tokens):
    i = pl.program_id(0)
    base = i * tm

    # ---- DMA row gather: emb_hbm[ids[base + t]] -> row_buf[t] -------------
    @pl.loop(0, tm)
    def _issue(t):
        # Clamp so the ragged last tile never reads ids / HBM out of bounds;
        # the corresponding output rows are past the array end and dropped.
        tok = jnp.minimum(base + t, n_tokens - 1)
        row = ids_ref[tok]
        pltpu.make_async_copy(emb_hbm.at[pl.ds(row, 1), :],
                              row_buf.at[pl.ds(t, 1), :],
                              sem.at[0]).start()

    @pl.loop(0, tm)
    def _drain(t):
        # All copies share one semaphore and have identical sizes, so one
        # wait per issued copy drains it (src slice of the wait descriptor
        # only provides the shape).
        pltpu.make_async_copy(emb_hbm.at[pl.ds(0, 1), :],
                              row_buf.at[pl.ds(t, 1), :],
                              sem.at[0]).wait()

    # ---- LayerNorm over hidden (biased variance, eps inside rsqrt) --------
    x = row_buf[...].astype(jnp.float32)
    mean = jnp.mean(x, axis=-1, keepdims=True)
    var = jnp.mean(jnp.square(x - mean), axis=-1, keepdims=True)
    y = (x - mean) * jax.lax.rsqrt(var + eps)
    y = y * gamma_ref[...] + beta_ref[...]          # (1, H) broadcast

    # Dropout(p=0) is identity.
    # TODO(synk): for production hidden dims not a multiple of 128, a
    # lane-dense output slab would avoid masked vst stores; skipped here.
    out_ref[...] = y.astype(out_ref.dtype)


def word_embedding_forward(input_ids, emb_table, gamma, beta,
                           *, eps=1e-5, tm=512):
    """input_ids: (B, S) int -> (B, S, H) float32."""
    b, s = input_ids.shape
    vocab, hidden = emb_table.shape
    n = b * s

    # Token tile: multiple of 8 (sublane), no larger than the (8-aligned)
    # number of tokens.
    n_ceil8 = ((n + 7) // 8) * 8
    tm = max(8, min(tm, n_ceil8))
    tm = ((tm + 7) // 8) * 8
    grid = (pl.cdiv(n, tm),)

    ids_flat = input_ids.reshape(-1).astype(jnp.int32)
    gamma2 = gamma.reshape(1, hidden).astype(jnp.float32)
    beta2 = beta.reshape(1, hidden).astype(jnp.float32)

    # VMEM: row_buf (tm*H) + double-buffered out block (2*tm*H) + tiny
    # gamma/beta blocks, plus headroom.
    itemsize = 4
    vmem_bytes = int(4 * tm * hidden * itemsize + (1 << 21))
    vmem_bytes = max(vmem_bytes, 1 << 23)

    kernel = functools.partial(_word_embedding_kernel,
                               eps=eps, tm=tm, n_tokens=n)

    out = pl.pallas_call(
        kernel,
        out_shape=jax.ShapeDtypeStruct((n, hidden), jnp.float32),
        grid_spec=pltpu.PrefetchScalarGridSpec(
            num_scalar_prefetch=1,                              # ids -> SMEM
            grid=grid,
            in_specs=[
                pl.BlockSpec(memory_space=pl.ANY),              # emb table stays in HBM
                pl.BlockSpec((1, hidden), lambda i, ids: (0, 0)),   # gamma
                pl.BlockSpec((1, hidden), lambda i, ids: (0, 0)),   # beta
            ],
            out_specs=pl.BlockSpec((tm, hidden), lambda i, ids: (i, 0)),
            scratch_shapes=[
                pltpu.VMEM((tm, hidden), emb_table.dtype),      # gathered rows
                pltpu.SemaphoreType.DMA((1,)),
            ]),
        compiler_params=pltpu.CompilerParams(
            dimension_semantics=("parallel",),
            vmem_limit_bytes=vmem_bytes),
    )(ids_flat, emb_table, gamma2, beta2)

    return out.reshape(b, s, hidden)


def _reference(input_ids, emb_table, gamma, beta, eps=1e-5):
    x = jnp.take(emb_table, input_ids, axis=0).astype(jnp.float32)
    mean = jnp.mean(x, axis=-1, keepdims=True)
    var = jnp.mean(jnp.square(x - mean), axis=-1, keepdims=True)
    return (x - mean) * jax.lax.rsqrt(var + eps) * gamma + beta


if __name__ == "__main__":
    vocab_size = 64
    hidden_dim = 32
    batch, seq = 2, 8
    eps = 1e-5

    key = jax.random.PRNGKey(0)
    k_emb, k_ids = jax.random.split(key)

    # kaiming_normal_ on a (vocab, hidden) weight: std = sqrt(2 / fan_in),
    # fan_in = hidden_dim. NOTE: kaiming_normal_ runs after nn.Embedding
    # zeroes padding_idx, so the padding row is NOT zero in the reference
    # module either.
    emb_table = (jax.random.normal(k_emb, (vocab_size, hidden_dim), jnp.float32)
                 * jnp.sqrt(2.0 / hidden_dim))
    gamma = jnp.ones((hidden_dim,), jnp.float32)   # LayerNorm weight
    beta = jnp.zeros((hidden_dim,), jnp.float32)   # LayerNorm bias

    input_ids = jax.random.randint(k_ids, (batch, seq), 0, vocab_size, jnp.int32)

    out = word_embedding_forward(input_ids, emb_table, gamma, beta, eps=eps)
    out = jax.block_until_ready(out)

    ref = _reference(input_ids, emb_table, gamma, beta, eps=eps)
    assert out.shape == (batch, seq, hidden_dim)
    assert jnp.allclose(out, ref, atol=1e-4, rtol=1e-4), "mismatch vs reference"

    print("KERNEL_OK")
</pallas_src>

<mosaic_0001>
module attributes {stable_mosaic.version = 11 : i64} {
  func.func @_word_embedding_kernel(%arg0: i32, %arg1: memref<16xi32, #tpu.memory_space<smem>>, %arg2: memref<64x32xf32, #tpu.memory_space<any>>, %arg3: memref<1x32xf32, #tpu.memory_space<vmem>>, %arg4: memref<1x32xf32, #tpu.memory_space<vmem>>, %arg5: memref<16x32xf32, #tpu.memory_space<vmem>>, %arg6: memref<16x32xf32, #tpu.memory_space<vmem>>, %arg7: memref<1x!tpu.dma_semaphore, #tpu.memory_space<semaphore_mem>>) attributes {dimension_semantics = [#tpu.dimension_semantics<parallel>], iteration_bounds = array<i64: 1>, scalar_prefetch = 1 : i64, scratch_operands = 2 : i64, tpu.core_type = #tpu.core_type<tc>, window_params = [{}, {pipeline_mode = #tpu.pipeline_mode<synchronous>, transform_indices = @transform_1, window_bounds = array<i64: 1, 32>}, {pipeline_mode = #tpu.pipeline_mode<synchronous>, transform_indices = @transform_2, window_bounds = array<i64: 1, 32>}, {transform_indices = @transform_3, window_bounds = array<i64: 16, 32>}]} {
    %c16_i32 = arith.constant 16 : i32
    %0 = arith.muli %arg0, %c16_i32 : i32
    %c0_i32 = arith.constant 0 : i32
    %c16_i32_0 = arith.constant 16 : i32
    %1 = arith.addi %c0_i32, %c16_i32_0 : i32
    %c1_i32 = arith.constant 1 : i32
    scf.for %arg8 = %c0_i32 to %1 step %c1_i32  : i32 {
      %c1_i32_17 = arith.constant 1 : i32
      %29 = arith.muli %arg8, %c1_i32_17 : i32
      %c0_i32_18 = arith.constant 0 : i32
      %30 = arith.addi %c0_i32_18, %29 : i32
      %31 = arith.addi %0, %30 : i32
      %c15_i32 = arith.constant 15 : i32
      %32 = arith.minsi %31, %c15_i32 : i32
      %33 = arith.index_cast %32 : i32 to index
      %34 = memref.load %arg1[%33] : memref<16xi32, #tpu.memory_space<smem>>
      %c0_i32_19 = arith.constant 0 : i32
      %c0_i32_20 = arith.constant 0 : i32
      %35 = tpu.memref_slice %arg2[%34, %c0_i32_20] : memref<64x32xf32, #tpu.memory_space<any>> -> memref<1x32xf32, #tpu.memory_space<any>>
      %c0_i32_21 = arith.constant 0 : i32
      %36 = tpu.memref_slice %arg6[%30, %c0_i32_21] : memref<16x32xf32, #tpu.memory_space<vmem>> -> memref<1x32xf32, #tpu.memory_space<vmem>>
      %37 = tpu.memref_slice %arg7[%c0_i32_19] : memref<1x!tpu.dma_semaphore, #tpu.memory_space<semaphore_mem>> -> memref<1x!tpu.dma_semaphore, #tpu.memory_space<semaphore_mem>>
      %38 = tpu.memref_squeeze %37 : memref<1x!tpu.dma_semaphore, #tpu.memory_space<semaphore_mem>> -> memref<!tpu.dma_semaphore, #tpu.memory_space<semaphore_mem>>
      tpu.enqueue_dma source(%35 : memref<1x32xf32, #tpu.memory_space<any>>) target(%36 : memref<1x32xf32, #tpu.memory_space<vmem>>) target_semaphore(%38 : memref<!tpu.dma_semaphore, #tpu.memory_space<semaphore_mem>>)
    }
    %c16_i32_1 = arith.constant 16 : i32
    %c0_i32_2 = arith.constant 0 : i32
    %c16_i32_3 = arith.constant 16 : i32
    %2 = arith.addi %c0_i32_2, %c16_i32_3 : i32
    %c1_i32_4 = arith.constant 1 : i32
    scf.for %arg8 = %c0_i32_2 to %2 step %c1_i32_4  : i32 {
      %c1_i32_17 = arith.constant 1 : i32
      %29 = arith.muli %arg8, %c1_i32_17 : i32
      %c0_i32_18 = arith.constant 0 : i32
      %30 = arith.addi %c0_i32_18, %29 : i32
      %c0_i32_19 = arith.constant 0 : i32
      %c0_i32_20 = arith.constant 0 : i32
      %c0_i32_21 = arith.constant 0 : i32
      %31 = tpu.memref_slice %arg2[%c0_i32_20, %c0_i32_21] : memref<64x32xf32, #tpu.memory_space<any>> -> memref<1x32xf32, #tpu.memory_space<any>>
      %c0_i32_22 = arith.constant 0 : i32
      %32 = tpu.memref_slice %arg6[%30, %c0_i32_22] : memref<16x32xf32, #tpu.memory_space<vmem>> -> memref<1x32xf32, #tpu.memory_space<vmem>>
      %33 = tpu.memref_slice %arg7[%c0_i32_19] : memref<1x!tpu.dma_semaphore, #tpu.memory_space<semaphore_mem>> -> memref<1x!tpu.dma_semaphore, #tpu.memory_space<semaphore_mem>>
      %34 = tpu.memref_squeeze %33 : memref<1x!tpu.dma_semaphore, #tpu.memory_space<semaphore_mem>> -> memref<!tpu.dma_semaphore, #tpu.memory_space<semaphore_mem>>
      tpu.wait_dma2 semaphore(%34 : memref<!tpu.dma_semaphore, #tpu.memory_space<semaphore_mem>>) src(%31 : memref<1x32xf32, #tpu.memory_space<any>>) dst(%32 : memref<1x32xf32, #tpu.memory_space<vmem>>)
    }
    %c16_i32_5 = arith.constant 16 : i32
    %c0 = arith.constant 0 : index
    %c0_6 = arith.constant 0 : index
    %3 = vector.load %arg6[%c0, %c0_6] : memref<16x32xf32, #tpu.memory_space<vmem>>, vector<16x32xf32>
    %cst = arith.constant dense<0.000000e+00> : vector<16xf32>
    %4 = vector.multi_reduction <add>, %3, %cst [1] : vector<16x32xf32> to vector<16xf32>
    %5 = vector.shape_cast %4 : vector<16xf32> to vector<16x1xf32>
    %cst_7 = arith.constant 3.200000e+01 : f32
    %6 = vector.broadcast %cst_7 : f32 to vector<16x1xf32>
    %7 = arith.divf %5, %6 : vector<16x1xf32>
    %8 = vector.broadcast %7 : vector<16x1xf32> to vector<16x32xf32>
    %9 = arith.subf %3, %8 : vector<16x32xf32>
    %10 = arith.mulf %9, %9 : vector<16x32xf32>
    %cst_8 = arith.constant dense<0.000000e+00> : vector<16xf32>
    %11 = vector.multi_reduction <add>, %10, %cst_8 [1] : vector<16x32xf32> to vector<16xf32>
    %12 = vector.shape_cast %11 : vector<16xf32> to vector<16x1xf32>
    %cst_9 = arith.constant 3.200000e+01 : f32
    %13 = vector.broadcast %cst_9 : f32 to vector<16x1xf32>
    %14 = arith.divf %12, %13 : vector<16x1xf32>
    %15 = vector.broadcast %7 : vector<16x1xf32> to vector<16x32xf32>
    %16 = arith.subf %3, %15 : vector<16x32xf32>
    %cst_10 = arith.constant 9.99999974E-6 : f32
    %17 = vector.broadcast %cst_10 : f32 to vector<16x1xf32>
    %18 = arith.addf %14, %17 : vector<16x1xf32>
    %19 = math.rsqrt %18 : vector<16x1xf32>
    %20 = vector.broadcast %19 : vector<16x1xf32> to vector<16x32xf32>
    %21 = arith.mulf %16, %20 : vector<16x32xf32>
    %c0_11 = arith.constant 0 : index
    %c0_12 = arith.constant 0 : index
    %22 = vector.load %arg3[%c0_11, %c0_12] : memref<1x32xf32, #tpu.memory_space<vmem>>, vector<1x32xf32>
    %23 = vector.broadcast %22 : vector<1x32xf32> to vector<16x32xf32>
    %24 = arith.mulf %21, %23 : vector<16x32xf32>
    %c0_13 = arith.constant 0 : index
    %c0_14 = arith.constant 0 : index
    %25 = vector.load %arg4[%c0_13, %c0_14] : memref<1x32xf32, #tpu.memory_space<vmem>>, vector<1x32xf32>
    %26 = vector.broadcast %25 : vector<1x32xf32> to vector<16x32xf32>
    %27 = arith.addf %24, %26 : vector<16x32xf32>
    %c0_15 = arith.constant 0 : index
    %c0_16 = arith.constant 0 : index
    %28 = vector.load %arg5[%c0_15, %c0_16] : memref<16x32xf32, #tpu.memory_space<vmem>>, vector<16x32xf32>
    tpu.vector_store %arg5[%c0_15, %c0_16], %27 {strides = array<i32>} : memref<16x32xf32, #tpu.memory_space<vmem>>, vector<16x32xf32>,
    return
  }
  func.func @transform_1(%arg0: i32, %arg1: memref<16xi32, #tpu.memory_space<smem>>) -> (i32, i32) {
    %c0_i32 = arith.constant 0 : i32
    %c0_i32_0 = arith.constant 0 : i32
    %c0_i32_1 = arith.constant 0 : i32
    return %c0_i32, %c0_i32_0 : i32, i32
  }
  func.func @transform_2(%arg0: i32, %arg1: memref<16xi32, #tpu.memory_space<smem>>) -> (i32, i32) {
    %c0_i32 = arith.constant 0 : i32
    %c0_i32_0 = arith.constant 0 : i32
    %c0_i32_1 = arith.constant 0 : i32
    return %c0_i32, %c0_i32_0 : i32, i32
  }
  func.func @transform_3(%arg0: i32, %arg1: memref<16xi32, #tpu.memory_space<smem>>) -> (i32, i32) {
    %c0_i32 = arith.constant 0 : i32
    %c0_i32_0 = arith.constant 0 : i32
    return %arg0, %c0_i32 : i32, i32
  }
}

</mosaic_0001>

<bundles_post_ra>
// kernel: tpu_custom_call.1
= control target key start
LH: loop header
LB: loop body
LE: loop exit
PB: predicated region body
PF: predicated region fallthrough
CT: control target
= control target key end

     0   :  { %s322_s0 = inlined_call_operand.vmem [shape: s32[16], index: 0, kind: input, shape index: {}]   ;;  %s323_s1 = inlined_call_operand.vmem [shape: f32[64,32], index: 1, kind: input, shape index: {}]   ;;  %s324_s2 = inlined_call_operand.vmem [shape: f32[1,32], index: 2, kind: input, shape index: {}]   ;;  %s325_s3 = inlined_call_operand.vmem [shape: f32[1,32], index: 3, kind: input, shape index: {}]   ;;  %s326_s4 = inlined_call_operand.hbm [shape: f32[16,32], index: 4, kind: output, shape index: {}]  }
   0x1   :  { %s9_s17 = sshll.u32 %s322_s0, 4  ;;  %s10_s17 = int_to_ptr.vmem [resolvable:$true] %s9_s17 }
   0x2   :  { %s207_s18 = scalar_lea.vmem %s10_s17, 16  ;;  %p212_p1 = scmp.lt.s32.totalorder %s10_s17, %s10_s17 }
   0x3   :  { %p208_p0 = scmp.ne.s32.totalorder %s10_s17, %s207_s18  ;;  %p213_p2 = scmp.lt.s32.totalorder %s207_s18, %s207_s18 }
   0x5   :  { %p214_p3 = por %p213_p2, %p212_p1 }
   0x7   :  { %p215_p4 = pnand %p214_p3, %p208_p0 }
   0x9   :  { %218 = shalt.err (!%p215_p4)  }
   0xa   :  { %s263_s19 = smov [#allocation5]  }
   0xb   :  { %12 = dma.vmem_to_smem %s10_s17, 16, %s263_s19, [#allocation4] }
   0xc   :  { %249 = dma.done.wait [#allocation4], 16 }
   0xd   :  { %250 = vsyncadd [#allocation4], 4294967280 }
   0xe   :  { %14 = sfence }
   0xf   :  { %15 = vsyncpa [#allocation7], 0  ;;  %s255_s20 = smov 0  }
  0x10 LB: > { %p28_p5 = scmp.lt.s32.totalorder %s257_s20, 15  ;;  %s32_s25 = scalar_lea.vmem [#allocation2], %s257_s20  ;;  %s257_s20 = sphi %s255_s20, %s26_s20  }
  0x12   : > { %s29_s0 = scalar_select %p28_p5, %s257_s20, 15 }
  0x14   : > { %s30_s21 = sld [smem:[#allocation5 + %s29_s0]] }
  0x1a   : > { %s31_s24 = scalar_lea.vmem %s323_s1, %s30_s21 }
  0x1b   : > { %v50_v0 = vld [vmem:[%s31_s24] sm:$0x1] }
  0x1c   : > { %51 = vst [vmem:[%s32_s25] sm:$0x1] %v50_v0 }
  0x1d   : > { %76 = vsyncadd [#allocation3], 16  ;;  %s26_s20 = sadd.s32 1, %s257_s20  }
  0x1e   : > { %p23_p6 = scmp.ge.s32.totalorder %s26_s20, 16  }
  0x1f   :  { %s259_s26 = smov (%p23_p6), 0  }
  0x20   :  { %25 = sbr.rel (!%p23_p6) target bundleno = 16 (0x10), region = 84 }
  0x27 LB: > { %251 = dma.done.wait [#allocation3], 16  ;;  %s261_s26 = sphi %s259_s26, %s82_s26  }
  0x28   : > { %252 = vsyncadd [#allocation3], 4294967280  ;;  %s82_s26 = sadd.s32 1, %s261_s26  }
  0x29   : > { %p79_p7 = scmp.ge.s32.totalorder %s82_s26, 16  }
  0x2a   :  { %v86_v1 = vld [vmem:[#allocation2] sm:$0xff] (%p79_p7)  ;;  %vm88_vm0 = vcmask (%p79_p7), 261120   ;;  %v87_v2 = vld [vmem:[#allocation2 + $0x8] sm:$0xff] (%p79_p7)  ;;  %s264_s30 = smov (%p79_p7), [#allocation6]  }
  0x2b   :  { %81 = sbr.rel (!%p79_p7) target bundleno = 39 (0x27), region = 95  ;;  %v89_v3 = vsel (%p79_p7), %vm88_vm0, %v86_v1, 0.0  ;;  %v92_v4 = vsel (%p79_p7), %vm88_vm0, %v87_v2, 0.0  ;;  %v180_v22 = vld [vmem:[%s324_s2] ss:$0 sm:$0xff] (%p79_p7)  ;;  %s141_s5 = sshll.u32 (%p79_p7), %s264_s30, 4  ;;  %s142_s5 = int_to_ptr.vmem [resolvable:$true] %s141_s5 }
  0x2c   :  { %90 = vadd.xlane.f32.xlu0 (%p79_p7), %v89_v3  ;;  %v181_v24 = vld [vmem:[%s325_s3] ss:$0 sm:$0xff] (%p79_p7)  ;;  %s219_s6 = scalar_lea.vmem (%p79_p7), %s142_s5, 256  ;;  %p224_p9 = scmp.lt.s32.totalorder (%p79_p7), %s142_s5, %s142_s5 }
  0x2d   :  { %p220_p8 = scmp.ne.s32.totalorder (%p79_p7), %s142_s5, %s219_s6  ;;  %p225_p10 = scmp.lt.s32.totalorder (%p79_p7), %s219_s6, %s219_s6 }
  0x2f   :  { %p226_p11 = por (%p79_p7), %p225_p10, %p224_p9 }
  0x30   :  { %93 = vadd.xlane.f32.xlu0 (%p79_p7), %v92_v4 }
  0x31   :  { %p227_p12 = pnand (%p79_p7), %p226_p11, %p220_p8 }
  0xb9   :  { %v91_v5 = vpop.xlane.xlu0 %90 }
  0xba   :  { %v96_v6 = vmul.f32 0.03125, %v91_v5 }
  0xbc   :  { %v98_v7 = vsub.f32 %v86_v1, %v96_v6 }
  0xbd   :  { %v94_v8 = vpop.xlane.xlu0 %93 }
  0xbe   :  { %v97_v9 = vmul.f32 0.03125, %v94_v8  ;;  %v100_v10 = vmul.f32 %v98_v7, %v98_v7 }
  0xc0   :  { %v99_v11 = vsub.f32 %v87_v2, %v97_v9  ;;  %v102_v12 = vsel %vm88_vm0, %v100_v10, 0.0 }
  0xc1   :  { %103 = vadd.xlane.f32.xlu1 %v102_v12 }
  0xc2   :  { %v101_v13 = vmul.f32 %v99_v11, %v99_v11 }
  0xc4   :  { %v105_v14 = vsel %vm88_vm0, %v101_v13, 0.0 }
  0xc5   :  { %106 = vadd.xlane.f32.xlu1 %v105_v14 }
 0x14e   :  { %v104_v15 = vpop.xlane.xlu1 %103 }
 0x14f   :  { %v108_v16 = vmul.f32 0.03125, %v104_v15 }
 0x151   :  { %v110_v17 = vadd.f32 1e-05, %v108_v16 }
 0x152   :  { %v107_v18 = vpop.xlane.xlu1 %106 }
 0x153   :  { %203 = vrsqrt.f32 %v110_v17  ;;  %v109_v19 = vmul.f32 0.03125, %v107_v18 }
 0x155   :  { %v111_v20 = vadd.f32 1e-05, %v109_v19 }
 0x157   :  { %205 = vrsqrt.f32 %v111_v20 }
 0x15d   :  { %v204_v21 = vpop.eup %203 }
 0x15e   :  { %v114_v23 = vmul.f32 %v204_v21, %v98_v7 }
 0x160   :  { %v123_v25 = vmul.f32 %v180_v22, %v114_v23 }
 0x161   :  { %v206_v26 = vpop.eup %205 }
 0x162   :  { %v115_v27 = vmul.f32 %v206_v26, %v99_v11  ;;  %v132_v28 = vadd.f32 %v181_v24, %v123_v25 }
 0x164   :  { %v124_v29 = vmul.f32 %v180_v22, %v115_v27  ;;  %134 = vst.msk [vmem:[#allocation6] sm:$0xff] %vm88_vm0, %v132_v28 }
 0x166   :  { %v133_v30 = vadd.f32 %v181_v24, %v124_v29 }
 0x168   :  { %135 = vst.msk [vmem:[#allocation6 + $0x8] sm:$0xff] %vm88_vm0, %v133_v30 }
 0x169   :  { %230 = shalt.err (!%p227_p12)
}
 0x16a   :  { %s231_s7 = scalar_lea.hbm %s326_s4, 256 }
 0x16b   :  { %p232_p13 = scmp.ne.s32.totalorder %s326_s4, %s231_s7  ;;  %p235_p0 = scmp.lt.u32.totalorder %s231_s7, %s326_s4 }
 0x16d   :  { %p237_p1 = pnand %p235_p0, %p232_p13 }
 0x16f   :  { %240 = shalt.err (!%p237_p1)
}
 0x170   :  { %s265_s12 = smov 128   ;;  %s266_s13 = smov 8  }
 0x171   :  { %147 = dma.vmem_to_hbm [thread:$0]  %s142_s5, 256, %s326_s4, [#allocation7], %s265_s12, %s265_s12, %s266_s13  }
 0x172   :  { %253 = dma.done.wait [#allocation7], 256  }
 0x173   :  { %254 = vsyncadd [#allocation7], 4294967040 }
 0x174   :  { %151 = vsyncpa [#allocation7], 1 }
 0x175   :  { %152 = vsyncmov [#allocation3] }
 0x178   :  { %s153_s16 = vpop.sfrf %152 }
 0x179   :  { %p182_p2 = scmp.ne.s32.totalorder %s153_s16, 0 }
 0x17b   :  { %157 = shalt.err (%p182_p2)  }

</bundles_post_ra>
